<compile_context>
chip_gen: v7x
topology: tpu7x:2x2x1
jax: 0.10.0
libtpu: 0.0.40
codegen_flags: <defaults>
</compile_context>

<pallas_src>
import functools

import jax
import jax.numpy as jnp
from jax.experimental import pallas as pl
from jax.experimental.pallas import tpu as pltpu

LANE = 128
SUBLANE = 8


def _round_up(n, m):
    return ((n + m - 1) // m) * m


def _choose_batch_tile(B):
    """Large MXU-filling tiles, but keep >=2 grid steps when B allows so the
    'parallel' batch axis can shard across v7x's two TensorCores."""
    if B <= SUBLANE:
        return SUBLANE
    half = _round_up((B + 1) // 2, SUBLANE)
    return min(256, half)


def rnn_kernel(x_ref, h0_ref, wih_t_ref, whh_t_ref, wlin_t_ref,
               b_rnn_ref, b_lin_ref, logp_ref, hn_ref, *, h0_is_zero):
    """One batch tile of names, whole sequence, statically unrolled recurrence.

    x_ref:      [seq, Bt, in_pad]   time-major batch tile (lane-dense input)
    h0_ref:     [Bt, hidden]        (ignored when h0_is_zero)
    wih_t_ref:  [in_pad, hidden]    W_ih^T, zero-padded rows
    whh_t_ref:  [hidden, hidden]    W_hh^T
    wlin_t_ref: [hidden, out_pad]   W_lin^T, zero-padded to lane-dense width
    b_rnn_ref:  [1, hidden]         b_ih + b_hh (folded), f32
    b_lin_ref:  [1, out_pad]        b_lin, padded lanes = -1e30, f32
    logp_ref:   [Bt, out_pad]       lane-dense log-probs (valid: output_size)
    hn_ref:     [Bt, hidden]        final hidden state (f32)
    """
    seq, bt, in_pad = x_ref.shape
    hid = whh_t_ref.shape[0]
    cdt = whh_t_ref.dtype            # MXU operand dtype (f32 or bf16)

    wih_t = wih_t_ref[...]
    whh_t = whh_t_ref[...]
    b_rnn = b_rnn_ref[...]           # f32

    # Whole-sequence input projection in a single MXU pass:
    #   [seq*Bt, in_pad] @ [in_pad, hid] + (b_ih + b_hh), f32 accumulation.
    x_all = x_ref[...].reshape(seq * bt, in_pad)
    pre = (jnp.dot(x_all, wih_t, preferred_element_type=jnp.float32)
           + b_rnn).reshape(seq, bt, hid)

    # Sequential recurrence, fully unrolled (seq is a compile-time constant):
    #   h_t = tanh(x_t W_ih^T + b_ih + b_hh + h_{t-1} W_hh^T)
    if h0_is_zero:
        h = jnp.tanh(pre[0])         # h0 == 0  ->  skip the step-0 h @ W_hh
        t0 = 1
    else:
        h = h0_ref[...].astype(jnp.float32)
        t0 = 0
    for t in range(t0, seq):
        hh = jnp.dot(h.astype(cdt), whh_t, preferred_element_type=jnp.float32)
        h = jnp.tanh(pre[t] + hh)

    # Linear head on the last hidden state + numerically stable log-softmax.
    # Padded lanes: zero weight columns + -1e30 bias -> exp() == 0, so they do
    # not perturb max / logsumexp over the real classes.
    logits = (jnp.dot(h.astype(cdt), wlin_t_ref[...],
                      preferred_element_type=jnp.float32)
              + b_lin_ref[...])                               # [Bt, out_pad]
    m = jnp.max(logits, axis=-1, keepdims=True)
    shifted = logits - m
    lse = jnp.log(jnp.sum(jnp.exp(shifted), axis=-1, keepdims=True))
    logp_ref[...] = shifted - lse
    hn_ref[...] = h


def rnn_forward_batched(x_b, h0_b, params, *, batch_tile=None,
                        compute_dtype=jnp.float32, h0_is_zero=False):
    """Batched forward over B independent names.

    x_b: [B, seq, input] f32,  h0_b: [B, hidden] f32.
    Returns (log_probs [B, output_size], hn [B, hidden])."""
    wih, bih, whh, bhh, wlin, blin = params
    B, seq_len, input_size = x_b.shape
    hidden_size = whh.shape[0]
    output_size = wlin.shape[0]
    in_pad = _round_up(input_size, LANE)
    out_pad = _round_up(output_size, LANE)

    if batch_tile is None:
        batch_tile = _choose_batch_tile(B)
    B_pad = _round_up(B, batch_tile)      # pad ragged batches (rows sliced off)
    n_tiles = B_pad // batch_tile

    # Time-major, lane-dense (input padded 57 -> 128), batch-padded x.
    # (The transpose is an extra HBM pass over x; negligible at these sizes.)
    x_tm = jnp.transpose(x_b, (1, 0, 2)).astype(compute_dtype)  # [seq, B, in]
    x_tm = jnp.pad(x_tm, ((0, 0), (0, B_pad - B), (0, in_pad - input_size)))
    h0_p = jnp.pad(h0_b.astype(jnp.float32), ((0, B_pad - B), (0, 0)))

    # Pre-transposed (MXU-dtype) weights; folded f32 RNN bias; lane-dense head.
    wih_t = jnp.pad(wih.T.astype(compute_dtype),
                    ((0, in_pad - input_size), (0, 0)))         # [in_pad, hid]
    whh_t = whh.T.astype(compute_dtype)                         # [hid, hid]
    wlin_t_pad = jnp.zeros((hidden_size, out_pad), compute_dtype)
    wlin_t_pad = wlin_t_pad.at[:, :output_size].set(wlin.T.astype(compute_dtype))
    b_rnn = (bih + bhh).reshape(1, hidden_size).astype(jnp.float32)
    b_lin_pad = jnp.full((1, out_pad), -1e30, jnp.float32)
    b_lin_pad = b_lin_pad.at[0, :output_size].set(blin.astype(jnp.float32))

    def full(shape):   # whole-array block; constant index_map -> fetched once
        return pl.BlockSpec(shape, lambda g: (0,) * len(shape))

    kernel = functools.partial(rnn_kernel, h0_is_zero=h0_is_zero)

    logp_pad, hn = pl.pallas_call(
        kernel,
        out_shape=(jax.ShapeDtypeStruct((B_pad, out_pad), jnp.float32),
                   jax.ShapeDtypeStruct((B_pad, hidden_size), jnp.float32)),
        grid=(n_tiles,),
        in_specs=[
            pl.BlockSpec((seq_len, batch_tile, in_pad), lambda g: (0, g, 0)),
            pl.BlockSpec((batch_tile, hidden_size), lambda g: (g, 0)),
            full((in_pad, hidden_size)),
            full((hidden_size, hidden_size)),
            full((hidden_size, out_pad)),
            full((1, hidden_size)),
            full((1, out_pad)),
        ],
        out_specs=(
            pl.BlockSpec((batch_tile, out_pad), lambda g: (g, 0)),
            pl.BlockSpec((batch_tile, hidden_size), lambda g: (g, 0)),
        ),
        compiler_params=pltpu.CompilerParams(
            dimension_semantics=("parallel",)),   # batch tiles shard across TCs
    )(x_tm, h0_p, wih_t, whh_t, wlin_t_pad, b_rnn, b_lin_pad)

    return logp_pad[:B, :output_size], hn[:B]


def rnn_forward(x, h0, params):
    """Module-faithful forward: x [seq, input], hidden [1, 1, hidden].
    Returns (log_probs [1, output_size], hn [1, 1, hidden])."""
    hidden_size = params[2].shape[0]
    logp, hn = rnn_forward_batched(x[None], h0.reshape(1, hidden_size), params)
    return logp, hn.reshape(1, 1, hidden_size)


def init_params(key, input_size, hidden_size, output_size):
    """Deterministic init mimicking PyTorch's uniform(-1/sqrt(hidden), 1/sqrt(hidden))."""
    k = 1.0 / jnp.sqrt(jnp.float32(hidden_size))
    keys = jax.random.split(key, 6)
    wih = jax.random.uniform(keys[0], (hidden_size, input_size), jnp.float32, -k, k)
    bih = jax.random.uniform(keys[1], (hidden_size,), jnp.float32, -k, k)
    whh = jax.random.uniform(keys[2], (hidden_size, hidden_size), jnp.float32, -k, k)
    bhh = jax.random.uniform(keys[3], (hidden_size,), jnp.float32, -k, k)
    wlin = jax.random.uniform(keys[4], (output_size, hidden_size), jnp.float32, -k, k)
    blin = jax.random.uniform(keys[5], (output_size,), jnp.float32, -k, k)
    return wih, bih, whh, bhh, wlin, blin


def reference_forward(x, h0, params):
    """Pure-JAX reference matching PyTorch semantics, for validation."""
    wih, bih, whh, bhh, wlin, blin = params
    h = h0.reshape(1, -1)
    for t in range(x.shape[0]):
        h = jnp.tanh(x[t:t + 1] @ wih.T + bih + h @ whh.T + bhh)
    logits = h @ wlin.T + blin
    return jax.nn.log_softmax(logits, axis=-1), h.reshape(1, 1, -1)


if __name__ == "__main__":
    # Shapes of the name-classification module: 6-char name one-hot over 57
    # letters, hidden 128, 18 language classes. batch=20 (not a tile multiple)
    # exercises the batch-padding path and yields 2 parallel grid tiles of 16.
    seq_len, input_size, hidden_size, output_size = 6, 57, 128, 18
    batch = 20

    key = jax.random.PRNGKey(0)
    k_x, k_p = jax.random.split(key)
    x_b = jax.random.normal(k_x, (batch, seq_len, input_size), jnp.float32)
    h0_b = jnp.zeros((batch, hidden_size), jnp.float32)   # RNN.inithidden() per name
    params = init_params(k_p, input_size, hidden_size, output_size)

    # f32 path (validated to 1e-5).
    fwd_f32 = jax.jit(functools.partial(rnn_forward_batched, h0_is_zero=True))
    logp_b, hn_b = fwd_f32(x_b, h0_b, params)
    jax.block_until_ready((logp_b, hn_b))

    # bf16 MXU-operand path (v6e/v7x rate win), f32 accumulation — loose tolerance.
    fwd_bf16 = jax.jit(functools.partial(rnn_forward_batched,
                                         compute_dtype=jnp.bfloat16,
                                         h0_is_zero=True))
    logp_bf, hn_bf = fwd_bf16(x_b, h0_b, params)
    jax.block_until_ready((logp_bf, hn_bf))

    # Module-faithful single-name path (same signature as the PyTorch forward).
    h0 = jnp.zeros((1, 1, hidden_size), jnp.float32)
    logp_1, hn_1 = rnn_forward(x_b[0], h0, params)
    jax.block_until_ready((logp_1, hn_1))

    # Validate every name against the pure-JAX (PyTorch-semantics) reference.
    for b in range(batch):
        ref_out, ref_hn = reference_forward(x_b[b], h0, params)
        assert jnp.allclose(logp_b[b:b + 1], ref_out, atol=1e-5, rtol=1e-5)
        assert jnp.allclose(hn_b[b], ref_hn.reshape(-1), atol=1e-5, rtol=1e-5)
        assert jnp.allclose(logp_bf[b:b + 1], ref_out, atol=5e-2, rtol=5e-2)
    ref_out0, ref_hn0 = reference_forward(x_b[0], h0, params)
    assert jnp.allclose(logp_1, ref_out0, atol=1e-5, rtol=1e-5)
    assert jnp.allclose(hn_1, ref_hn0, atol=1e-5, rtol=1e-5)

    print("KERNEL_OK")
</pallas_src>

<mosaic_0001>
module attributes {stable_mosaic.version = 11 : i64} {
  func.func @rnn_kernel(%arg0: i32, %arg1: memref<6x16x128xf32, #tpu.memory_space<vmem>>, %arg2: memref<16x128xf32, #tpu.memory_space<vmem>>, %arg3: memref<128x128xf32, #tpu.memory_space<vmem>>, %arg4: memref<128x128xf32, #tpu.memory_space<vmem>>, %arg5: memref<128x128xf32, #tpu.memory_space<vmem>>, %arg6: memref<1x128xf32, #tpu.memory_space<vmem>>, %arg7: memref<1x128xf32, #tpu.memory_space<vmem>>, %arg8: memref<16x128xf32, #tpu.memory_space<vmem>>, %arg9: memref<16x128xf32, #tpu.memory_space<vmem>>) attributes {dimension_semantics = [#tpu.dimension_semantics<parallel>], iteration_bounds = array<i64: 2>, scalar_prefetch = 0 : i64, scratch_operands = 0 : i64, tpu.core_type = #tpu.core_type<tc>, window_params = [{transform_indices = @transform_0, window_bounds = array<i64: 6, 16, 128>}, {transform_indices = @transform_1, window_bounds = array<i64: 16, 128>}, {pipeline_mode = #tpu.pipeline_mode<synchronous>, transform_indices = @transform_2, window_bounds = array<i64: 128, 128>}, {pipeline_mode = #tpu.pipeline_mode<synchronous>, transform_indices = @transform_3, window_bounds = array<i64: 128, 128>}, {pipeline_mode = #tpu.pipeline_mode<synchronous>, transform_indices = @transform_4, window_bounds = array<i64: 128, 128>}, {pipeline_mode = #tpu.pipeline_mode<synchronous>, transform_indices = @transform_5, window_bounds = array<i64: 1, 128>}, {pipeline_mode = #tpu.pipeline_mode<synchronous>, transform_indices = @transform_6, window_bounds = array<i64: 1, 128>}, {transform_indices = @transform_7, window_bounds = array<i64: 16, 128>}, {transform_indices = @transform_8, window_bounds = array<i64: 16, 128>}]} {
    %c0 = arith.constant 0 : index
    %c0_0 = arith.constant 0 : index
    %0 = vector.load %arg3[%c0, %c0_0] : memref<128x128xf32, #tpu.memory_space<vmem>>, vector<128x128xf32>
    %c0_1 = arith.constant 0 : index
    %c0_2 = arith.constant 0 : index
    %1 = vector.load %arg4[%c0_1, %c0_2] : memref<128x128xf32, #tpu.memory_space<vmem>>, vector<128x128xf32>
    %c0_3 = arith.constant 0 : index
    %c0_4 = arith.constant 0 : index
    %2 = vector.load %arg6[%c0_3, %c0_4] : memref<1x128xf32, #tpu.memory_space<vmem>>, vector<1x128xf32>
    %c0_5 = arith.constant 0 : index
    %c0_6 = arith.constant 0 : index
    %c0_7 = arith.constant 0 : index
    %3 = vector.load %arg1[%c0_5, %c0_6, %c0_7] : memref<6x16x128xf32, #tpu.memory_space<vmem>>, vector<6x16x128xf32>
    %4 = vector.shape_cast %3 : vector<6x16x128xf32> to vector<96x128xf32>
    %cst = arith.constant dense<0.000000e+00> : vector<96x128xf32>
    %5 = tpu.matmul %4, %0, %cst {dimension_numbers = #tpu.dot_dimension_numbers<[1], [0], [0], [1], [0, 0, 1, 1], [], []>} : vector<96x128xf32>, vector<128x128xf32>, vector<96x128xf32> -> vector<96x128xf32>
    %6 = vector.broadcast %2 : vector<1x128xf32> to vector<96x128xf32>
    %7 = arith.addf %5, %6 : vector<96x128xf32>
    %8 = vector.shape_cast %7 : vector<96x128xf32> to vector<6x16x128xf32>
    %9 = vector.extract_strided_slice %8 {offsets = [0, 0, 0], sizes = [1, 16, 128], strides = [1, 1, 1]} : vector<6x16x128xf32> to vector<1x16x128xf32>
    %10 = vector.shape_cast %9 : vector<1x16x128xf32> to vector<16x128xf32>
    %11 = math.tanh %10 : vector<16x128xf32>
    %cst_8 = arith.constant dense<0.000000e+00> : vector<16x128xf32>
    %12 = tpu.matmul %11, %1, %cst_8 {dimension_numbers = #tpu.dot_dimension_numbers<[1], [0], [0], [1], [0, 0, 1, 1], [], []>} : vector<16x128xf32>, vector<128x128xf32>, vector<16x128xf32> -> vector<16x128xf32>
    %13 = vector.extract_strided_slice %8 {offsets = [1, 0, 0], sizes = [1, 16, 128], strides = [1, 1, 1]} : vector<6x16x128xf32> to vector<1x16x128xf32>
    %14 = vector.shape_cast %13 : vector<1x16x128xf32> to vector<16x128xf32>
    %15 = arith.addf %14, %12 : vector<16x128xf32>
    %16 = math.tanh %15 : vector<16x128xf32>
    %cst_9 = arith.constant dense<0.000000e+00> : vector<16x128xf32>
    %17 = tpu.matmul %16, %1, %cst_9 {dimension_numbers = #tpu.dot_dimension_numbers<[1], [0], [0], [1], [0, 0, 1, 1], [], []>} : vector<16x128xf32>, vector<128x128xf32>, vector<16x128xf32> -> vector<16x128xf32>
    %18 = vector.extract_strided_slice %8 {offsets = [2, 0, 0], sizes = [1, 16, 128], strides = [1, 1, 1]} : vector<6x16x128xf32> to vector<1x16x128xf32>
    %19 = vector.shape_cast %18 : vector<1x16x128xf32> to vector<16x128xf32>
    %20 = arith.addf %19, %17 : vector<16x128xf32>
    %21 = math.tanh %20 : vector<16x128xf32>
    %cst_10 = arith.constant dense<0.000000e+00> : vector<16x128xf32>
    %22 = tpu.matmul %21, %1, %cst_10 {dimension_numbers = #tpu.dot_dimension_numbers<[1], [0], [0], [1], [0, 0, 1, 1], [], []>} : vector<16x128xf32>, vector<128x128xf32>, vector<16x128xf32> -> vector<16x128xf32>
    %23 = vector.extract_strided_slice %8 {offsets = [3, 0, 0], sizes = [1, 16, 128], strides = [1, 1, 1]} : vector<6x16x128xf32> to vector<1x16x128xf32>
    %24 = vector.shape_cast %23 : vector<1x16x128xf32> to vector<16x128xf32>
    %25 = arith.addf %24, %22 : vector<16x128xf32>
    %26 = math.tanh %25 : vector<16x128xf32>
    %cst_11 = arith.constant dense<0.000000e+00> : vector<16x128xf32>
    %27 = tpu.matmul %26, %1, %cst_11 {dimension_numbers = #tpu.dot_dimension_numbers<[1], [0], [0], [1], [0, 0, 1, 1], [], []>} : vector<16x128xf32>, vector<128x128xf32>, vector<16x128xf32> -> vector<16x128xf32>
    %28 = vector.extract_strided_slice %8 {offsets = [4, 0, 0], sizes = [1, 16, 128], strides = [1, 1, 1]} : vector<6x16x128xf32> to vector<1x16x128xf32>
    %29 = vector.shape_cast %28 : vector<1x16x128xf32> to vector<16x128xf32>
    %30 = arith.addf %29, %27 : vector<16x128xf32>
    %31 = math.tanh %30 : vector<16x128xf32>
    %cst_12 = arith.constant dense<0.000000e+00> : vector<16x128xf32>
    %32 = tpu.matmul %31, %1, %cst_12 {dimension_numbers = #tpu.dot_dimension_numbers<[1], [0], [0], [1], [0, 0, 1, 1], [], []>} : vector<16x128xf32>, vector<128x128xf32>, vector<16x128xf32> -> vector<16x128xf32>
    %33 = vector.extract_strided_slice %8 {offsets = [5, 0, 0], sizes = [1, 16, 128], strides = [1, 1, 1]} : vector<6x16x128xf32> to vector<1x16x128xf32>
    %34 = vector.shape_cast %33 : vector<1x16x128xf32> to vector<16x128xf32>
    %35 = arith.addf %34, %32 : vector<16x128xf32>
    %36 = math.tanh %35 : vector<16x128xf32>
    %c0_13 = arith.constant 0 : index
    %c0_14 = arith.constant 0 : index
    %37 = vector.load %arg5[%c0_13, %c0_14] : memref<128x128xf32, #tpu.memory_space<vmem>>, vector<128x128xf32>
    %cst_15 = arith.constant dense<0.000000e+00> : vector<16x128xf32>
    %38 = tpu.matmul %36, %37, %cst_15 {dimension_numbers = #tpu.dot_dimension_numbers<[1], [0], [0], [1], [0, 0, 1, 1], [], []>} : vector<16x128xf32>, vector<128x128xf32>, vector<16x128xf32> -> vector<16x128xf32>
    %c0_16 = arith.constant 0 : index
    %c0_17 = arith.constant 0 : index
    %39 = vector.load %arg7[%c0_16, %c0_17] : memref<1x128xf32, #tpu.memory_space<vmem>>, vector<1x128xf32>
    %40 = vector.broadcast %39 : vector<1x128xf32> to vector<16x128xf32>
    %41 = arith.addf %38, %40 : vector<16x128xf32>
    %cst_18 = arith.constant dense<0xFF800000> : vector<16xf32>
    %42 = vector.multi_reduction <maximumf>, %41, %cst_18 [1] : vector<16x128xf32> to vector<16xf32>
    %43 = vector.shape_cast %42 : vector<16xf32> to vector<16x1xf32>
    %44 = vector.broadcast %43 : vector<16x1xf32> to vector<16x128xf32>
    %45 = arith.subf %41, %44 : vector<16x128xf32>
    %46 = math.exp %45 : vector<16x128xf32>
    %cst_19 = arith.constant dense<0.000000e+00> : vector<16xf32>
    %47 = vector.multi_reduction <add>, %46, %cst_19 [1] : vector<16x128xf32> to vector<16xf32>
    %48 = vector.shape_cast %47 : vector<16xf32> to vector<16x1xf32>
    %49 = math.log %48 : vector<16x1xf32>
    %50 = vector.broadcast %49 : vector<16x1xf32> to vector<16x128xf32>
    %51 = arith.subf %45, %50 : vector<16x128xf32>
    %c0_20 = arith.constant 0 : index
    %c0_21 = arith.constant 0 : index
    %52 = vector.load %arg8[%c0_20, %c0_21] : memref<16x128xf32, #tpu.memory_space<vmem>>, vector<16x128xf32>
    tpu.vector_store %arg8[%c0_20, %c0_21], %51 {strides = array<i32>} : memref<16x128xf32, #tpu.memory_space<vmem>>, vector<16x128xf32>,
    %c0_22 = arith.constant 0 : index
    %c0_23 = arith.constant 0 : index
    %53 = vector.load %arg9[%c0_22, %c0_23] : memref<16x128xf32, #tpu.memory_space<vmem>>, vector<16x128xf32>
    tpu.vector_store %arg9[%c0_22, %c0_23], %36 {strides = array<i32>} : memref<16x128xf32, #tpu.memory_space<vmem>>, vector<16x128xf32>,
    return
  }
  func.func @transform_0(%arg0: i32) -> (i32, i32, i32) {
    %c0_i32 = arith.constant 0 : i32
    %c0_i32_0 = arith.constant 0 : i32
    %c0_i32_1 = arith.constant 0 : i32
    return %c0_i32, %arg0, %c0_i32_0 : i32, i32, i32
  }
  func.func @transform_1(%arg0: i32) -> (i32, i32) {
    %c0_i32 = arith.constant 0 : i32
    %c0_i32_0 = arith.constant 0 : i32
    return %arg0, %c0_i32 : i32, i32
  }
  func.func @transform_2(%arg0: i32) -> (i32, i32) {
    %c0_i32 = arith.constant 0 : i32
    %c0_i32_0 = arith.constant 0 : i32
    %c0_i32_1 = arith.constant 0 : i32
    return %c0_i32, %c0_i32_0 : i32, i32
  }
  func.func @transform_3(%arg0: i32) -> (i32, i32) {
    %c0_i32 = arith.constant 0 : i32
    %c0_i32_0 = arith.constant 0 : i32
    %c0_i32_1 = arith.constant 0 : i32
    return %c0_i32, %c0_i32_0 : i32, i32
  }
  func.func @transform_4(%arg0: i32) -> (i32, i32) {
    %c0_i32 = arith.constant 0 : i32
    %c0_i32_0 = arith.constant 0 : i32
    %c0_i32_1 = arith.constant 0 : i32
    return %c0_i32, %c0_i32_0 : i32, i32
  }
  func.func @transform_5(%arg0: i32) -> (i32, i32) {
    %c0_i32 = arith.constant 0 : i32
    %c0_i32_0 = arith.constant 0 : i32
    %c0_i32_1 = arith.constant 0 : i32
    return %c0_i32, %c0_i32_0 : i32, i32
  }
  func.func @transform_6(%arg0: i32) -> (i32, i32) {
    %c0_i32 = arith.constant 0 : i32
    %c0_i32_0 = arith.constant 0 : i32
    %c0_i32_1 = arith.constant 0 : i32
    return %c0_i32, %c0_i32_0 : i32, i32
  }
  func.func @transform_7(%arg0: i32) -> (i32, i32) {
    %c0_i32 = arith.constant 0 : i32
    %c0_i32_0 = arith.constant 0 : i32
    return %arg0, %c0_i32 : i32, i32
  }
  func.func @transform_8(%arg0: i32) -> (i32, i32) {
    %c0_i32 = arith.constant 0 : i32
    %c0_i32_0 = arith.constant 0 : i32
    return %arg0, %c0_i32 : i32, i32
  }
}

</mosaic_0001>

<bundles_post_ra>
// kernel: rnn_forward_batched.1
= control target key start
LH: loop header
LB: loop body
LE: loop exit
PB: predicated region body
PF: predicated region fallthrough
CT: control target
= control target key end

     0   :  { %s2009_s26 = smov 0   ;;  %s2011_s27 = smov 0   ;;  %s2357_s0 = inlined_call_operand.vmem [shape: f32[6,32,128], index: 0, kind: input, shape index: {}]   ;;  %s2358_s1 = inlined_call_operand.vmem [shape: f32[32,128], index: 1, kind: input, shape index: {}]   ;;  %s2359_s2 = inlined_call_operand.vmem [shape: f32[128,128], index: 2, kind: input, shape index: {}]   ;;  %s2360_s3 = inlined_call_operand.vmem [shape: f32[128,128], index: 3, kind: input, shape index: {}]   ;;  %s2361_s4 = inlined_call_operand.vmem [shape: f32[128,128], index: 4, kind: input, shape index: {}]   ;;  %s2362_s5 = inlined_call_operand.vmem [shape: f32[1,128], index: 5, kind: input, shape index: {}]   ;;  %s2363_s6 = inlined_call_operand.vmem [shape: f32[1,128], index: 6, kind: input, shape index: {}]   ;;  %s2364_s7 = inlined_call_operand.vmem [shape: f32[32,128], index: 7, kind: output, shape index: {0}]   ;;  %s2365_s8 = inlined_call_operand.vmem [shape: f32[32,128], index: 8, kind: output, shape index: {1}]  }
   0x1   :  { %s2013_s28 = smov 0  }
   0x2 LB: > { %s1226_s29 = sadd.s32 4294967295, %s1962_s28   ;;  %s2026_s30 = sadd.s32 1, %s1962_s28   ;;  %s1962_s28 = sphi %s2013_s28, %s2368_s28   ;;  %s1958_s27 = sphi %s2011_s27, %s2367_s27   ;;  %s1954_s26 = sphi %s2009_s26, %s2366_s26  }
   0x3   : > { %s23_s9 = ssub.s32 %s1962_s28, %s2026_s30  ;;  %s26_s10 = sadd.s32 1, %s1958_s27 }
   0x4   : > { %p24_p0 = scmp.eq.s32.totalorder %s23_s9, 0  ;;  %p33_p1 = scmp.ne.s32.totalorder %s1958_s27, %s1954_s26 }
   0x5   : > { %p34_p2 = scmp.eq.s32.totalorder %s1962_s28, 0  ;;  %p1229_p4 = scmp.ge.s32.totalorder %s1962_s28, 2 }
   0x6   : > { %s2035_s11 = scalar_select %p24_p0, %s1958_s27, %s26_s10  }
   0x7   : > { %p35_p3 = por %p34_p2, %p33_p1  ;;  %257 = sbr.rel (%p1229_p4) target bundleno = 24 (0x18), region = 36 }
   0xe   : > { %260 = sbr.rel (!%p35_p3) target bundleno = 24 (0x18), region = 40  ;;  %s262_s12 = sand.u32 (%p35_p3), 1, %s1958_s27  }
   0xf   : > { %s1241_s13 = sshll.u32 (%p35_p3), %s1962_s28, 4  ;;  %s1882_s14 = smul.u32 (%p35_p3), 96, %s262_s12 }
  0x10   : > { %s267_s17 = scalar_lea.vmem (%p35_p3), %s2357_s0, %s1241_s13 }
  0x11   : > { %v317_v0 = vld [vmem:[%s267_s17] sm:$0xff] (%p35_p3)  ;;  %v319_v1 = vld [vmem:[%s267_s17 + $0x8] sm:$0xff] (%p35_p3)  ;;  %s264_s18 = scalar_lea.vmem (%p35_p3), [#allocation2], %s1882_s14 }
  0x12   : > { %v321_v2 = vld [vmem:[%s267_s17 + $0x20] sm:$0xff] (%p35_p3)  ;;  %v323_v3 = vld [vmem:[%s267_s17 + $0x28] sm:$0xff] (%p35_p3)  ;;  %318 = vst [vmem:[%s264_s18] sm:$0xff] (%p35_p3), %v317_v0  ;;  %320 = vst [vmem:[%s264_s18 + $0x8] sm:$0xff] (%p35_p3), %v319_v1 }
  0x13   : > { %v325_v4 = vld [vmem:[%s267_s17 + $0x40] sm:$0xff] (%p35_p3)  ;;  %v327_v5 = vld [vmem:[%s267_s17 + $0x48] sm:$0xff] (%p35_p3)  ;;  %322 = vst [vmem:[%s264_s18 + $0x10] sm:$0xff] (%p35_p3), %v321_v2  ;;  %324 = vst [vmem:[%s264_s18 + $0x18] sm:$0xff] (%p35_p3), %v323_v3 }
  0x14   : > { %326 = vst [vmem:[%s264_s18 + $0x20] sm:$0xff] (%p35_p3), %v325_v4  ;;  %328 = vst [vmem:[%s264_s18 + $0x28] sm:$0xff] (%p35_p3), %v327_v5  ;;  %v329_v6 = vld [vmem:[%s267_s17 + $0x60] sm:$0xff] (%p35_p3)  ;;  %v331_v7 = vld [vmem:[%s267_s17 + $0x68] sm:$0xff] (%p35_p3) }
  0x15   : > { %v333_v8 = vld [vmem:[%s267_s17 + $0x80] sm:$0xff]  ;;  %330 = vst [vmem:[%s264_s18 + $0x30] sm:$0xff] %v329_v6  ;;  %332 = vst [vmem:[%s264_s18 + $0x38] sm:$0xff] %v331_v7  ;;  %v335_v9 = vld [vmem:[%s267_s17 + $0x88] sm:$0xff] }
  0x16   : > { %334 = vst [vmem:[%s264_s18 + $0x40] sm:$0xff] %v333_v8  ;;  %v337_v10 = vld [vmem:[%s267_s17 + $0xa0] sm:$0xff]  ;;  %v339_v11 = vld [vmem:[%s267_s17 + $0xa8] sm:$0xff]  ;;  %336 = vst [vmem:[%s264_s18 + $0x48] sm:$0xff] %v335_v9 }
  0x17   : > { %338 = vst [vmem:[%s264_s18 + $0x50] sm:$0xff] %v337_v10  ;;  %340 = vst [vmem:[%s264_s18 + $0x58] sm:$0xff] %v339_v11 }
  0x18 PF: > { %p1232_p5 = scmp.ge.s32.totalorder %s1962_s28, 1  ;;  %p354_p6 = scmp.lt.s32.totalorder %s1962_s28, 3 }
  0x1a   : > { %p355_p7 = pnand %p1232_p5, %p354_p6 }
  0x1b   : > { %v423_v12 = vld [vmem:[%s2359_s2] sm:$0xff] (!%p355_p7)  ;;  %v424_v13 = vld [vmem:[%s2359_s2 + $0x8] sm:$0xff] (!%p355_p7)  ;;  %v425_v14 = vld [vmem:[%s2359_s2 + $0x10] sm:$0xff] (!%p355_p7)  ;;  %s361_s25 = sand.u32 (!%p355_p7), 1, %s1954_s26   ;;  %s1233_s15 = sshll.u32 (!%p355_p7), %s1226_s29, 1 }
  0x1c   : > { %358 = sbr.rel (%p355_p7) target bundleno = 1958 (0x7a6), region = 82  ;;  %v1638_v15 = vpack.c.bf16 (!%p355_p7), %v424_v13, %v423_v12  ;;  %v426_v16 = vld [vmem:[%s2359_s2 + $0x18] sm:$0xff] (!%p355_p7)  ;;  %v427_v18 = vld [vmem:[%s2359_s2 + $0x20] sm:$0xff] (!%p355_p7)  ;;  %v428_v19 = vld [vmem:[%s2359_s2 + $0x28] sm:$0xff] (!%p355_p7)  ;;  %p412_p8 = scmp.lt.s32.totalorder (!%p355_p7), %s1233_s15, 3 }
  0x1d   : > { %s1883_s10 = smul.u32 (!%p355_p7), 96, %s361_s25  ;;  %v1642_v17 = vpack.c.bf16 (!%p355_p7), %v426_v16, %v425_v14  ;;  %v1646_v20 = vpack.c.bf16 (!%p355_p7), %v428_v19, %v427_v18  ;;  %v429_v21 = vld [vmem:[%s2359_s2 + $0x30] sm:$0xff] (!%p355_p7)  ;;  %v430_v22 = vld [vmem:[%s2359_s2 + $0x38] sm:$0xff] (!%p355_p7)  ;;  %v439_v24 = vld [vmem:[%s2360_s3] sm:$0xff] (!%p355_p7) }
  0x1e   : > { %1639 = vmatprep.subr.bf16.mxu1 (!%p355_p7), %v1638_v15  ;;  %v440_v25 = vld [vmem:[%s2360_s3 + $0x8] sm:$0xff] (!%p355_p7)  ;;  %v441_v26 = vld [vmem:[%s2360_s3 + $0x10] sm:$0xff] (!%p355_p7)  ;;  %v442_v28 = vld [vmem:[%s2360_s3 + $0x18] sm:$0xff] (!%p355_p7)  ;;  %v1650_v29 = vpack.c.bf16 (!%p355_p7), %v430_v22, %v429_v21 }
  0x1f   : > { %1641 = vmatpush3.bf16.msra.mxu1 (!%p355_p7), %v1638_v15  ;;  %s2070_s19 = scalar_lea.vmem (!%p355_p7), [#allocation2], %s1883_s10  ;;  %v2082_v27 = vpack.c.bf16 (!%p355_p7), %v440_v25, %v439_v24  ;;  %v431_v30 = vld [vmem:[%s2359_s2 + $0x40] sm:$0xff] (!%p355_p7)  ;;  %v2090_v31 = vpack.c.bf16 (!%p355_p7), %v442_v28, %v441_v26  ;;  %v432_v32 = vld [vmem:[%s2359_s2 + $0x48] sm:$0xff] (!%p355_p7)  ;;  %v433_v36 = vld [vmem:[%s2359_s2 + $0x50] sm:$0xff] (!%p355_p7) }
  0x20   : > { %1643 = vmatprep.subr.bf16.mxu1 (!%p355_p7), %v1642_v17  ;;  %v456_v23 = vld [vmem:[%s2070_s19] sm:$0xff] (!%p355_p7)  ;;  %v444_v34 = vld [vmem:[%s2360_s3 + $0x28] sm:$0xff] (!%p355_p7)  ;;  %v1654_v35 = vpack.c.bf16 (!%p355_p7), %v432_v32, %v431_v30  ;;  %v434_v38 = vld [vmem:[%s2359_s2 + $0x58] sm:$0xff] (!%p355_p7) }
  0x21   : > { %1410 = vmatprep.mubr.f32.mxu1 (!%p355_p7), %v456_v23  ;;  %1703 = vmatprep.subr.bf16.mxu0 (!%p355_p7), %v2082_v27  ;;  %v443_v33 = vld [vmem:[%s2360_s3 + $0x20] sm:$0xff] (!%p355_p7)  ;;  %v445_v39 = vld [vmem:[%s2360_s3 + $0x30] sm:$0xff] (!%p355_p7)  ;;  %v446_v40 = vld [vmem:[%s2360_s3 + $0x38] sm:$0xff] (!%p355_p7)  ;;  %v1658_v41 = vpack.c.bf16 (!%p355_p7), %v434_v38, %v433_v36 }
  0x22   : > { %1705 = vmatpush3.bf16.msra.mxu0 (!%p355_p7), %v2082_v27  ;;  %v2107_v37 = vpack.c.bf16 (!%p355_p7), %v444_v34, %v443_v33  ;;  %v2120_v42 = vpack.c.bf16 (!%p355_p7), %v446_v40, %v445_v39  ;;  %v435_v43 = vld [vmem:[%s2359_s2 + $0x60] sm:$0xff] (!%p355_p7)  ;;  %v436_v44 = vld [vmem:[%s2359_s2 + $0x68] sm:$0xff] (!%p355_p7)  ;;  %v437_v46 = vld [vmem:[%s2359_s2 + $0x70] sm:$0xff] (!%p355_p7) }
  0x23   : > { %1645 = vmatpush3.bf16.msra.mxu1 %v1642_v17  ;;  %1707 = vmatprep.subr.bf16.mxu0 %v2090_v31  ;;  %v1662_v45 = vpack.c.bf16 %v436_v44, %v435_v43  ;;  %v438_v47 = vld [vmem:[%s2359_s2 + $0x78] sm:$0xff]  ;;  %v457_v49 = vld [vmem:[%s2070_s19 + $0x8] sm:$0xff]  ;;  %v458_v50 = vld [vmem:[%s2070_s19 + $0x10] sm:$0xff]  ;;  %s2370_s15 = smov (!%p412_p8, %s1233_s15), 3 }
  0x24   : > { %1647 = vmatprep.subr.bf16.mxu1 %v1646_v20  ;;  %v1666_v48 = vpack.c.bf16 %v438_v47, %v437_v46  ;;  %v459_v51 = vld [vmem:[%s2070_s19 + $0x18] sm:$0xff]  ;;  %v460_v52 = vld [vmem:[%s2070_s19 + $0x20] sm:$0xff]  ;;  %v461_v53 = vld [vmem:[%s2070_s19 + $0x28] sm:$0xff]  ;;  %s1234_s26 = sshll.u32 %s2370_s15, 3 }
  0x25   : > { %v447_v54 = vld [vmem:[%s2360_s3 + $0x40] sm:$0xff]  ;;  %v448_v55 = vld [vmem:[%s2360_s3 + $0x48] sm:$0xff]  ;;  %v462_v57 = vld [vmem:[%s2070_s19 + $0x30] sm:$0xff]  ;;  %s421_s16 = scalar_lea.vmem %s2365_s8, %s1234_s26  ;;  %s415_s21 = scalar_lea.vmem %s2364_s7, %s1234_s26 }
  0x26   : > { %1709 = vmatpush3.bf16.msra.mxu0 %v2090_v31  ;;  %v2156_v56 = vpack.c.bf16 %v448_v55, %v447_v54  ;;  %v449_v58 = vld [vmem:[%s2360_s3 + $0x50] sm:$0xff]  ;;  %v450_v59 = vld [vmem:[%s2360_s3 + $0x58] sm:$0xff]  ;;  %v464_v62 = vld [vmem:[%s2070_s19 + $0x40] sm:$0xff] }
  0x27   : > { %1649 = vmatpush3.bf16.msra.mxu1 %v1646_v20  ;;  %1711 = vmatprep.subr.bf16.mxu0 %v2107_v37  ;;  %v463_v60 = vld [vmem:[%s2070_s19 + $0x38] sm:$0xff]  ;;  %v2170_v61 = vpack.c.bf16 %v450_v59, %v449_v58  ;;  %v465_v63 = vld [vmem:[%s2070_s19 + $0x48] sm:$0xff]  ;;  %v451_v0 = vld [vmem:[%s2360_s3 + $0x60] sm:$0xff] }
  0x28   : > { %1651 = vmatprep.subr.bf16.mxu1 %v1650_v29  ;;  %v452_v1 = vld [vmem:[%s2360_s3 + $0x68] sm:$0xff]  ;;  %v466_v2 = vld [vmem:[%s2070_s19 + $0x50] sm:$0xff]  ;;  %v454_v5 = vld [vmem:[%s2360_s3 + $0x78] sm:$0xff] }
  0x29   : > { %v2184_v3 = vpack.c.bf16 %v452_v1, %v451_v0  ;;  %v453_v4 = vld [vmem:[%s2360_s3 + $0x70] sm:$0xff]  ;;  %v467_v7 = vld [vmem:[%s2070_s19 + $0x58] sm:$0xff]  ;;  %v2208_v8 = vld [vmem:[%s2362_s5] ss:$0 sm:$0xff] }
  0x2a   : > { %1713 = vmatpush3.bf16.msra.mxu0 %v2107_v37  ;;  %v2193_v6 = vpack.c.bf16 %v454_v5, %v453_v4  ;;  %v1002_v54 = vld [vmem:[%s2361_s4 + $0x30] sm:$0xff]  ;;  %v1003_v55 = vld [vmem:[%s2361_s4 + $0x38] sm:$0xff]  ;;  %v1004_v1 = vld [vmem:[%s2361_s4 + $0x40] sm:$0xff] }
  0x2b   : > { %1653 = vmatpush3.bf16.msra.mxu1 %v1650_v29  ;;  %1715 = vmatprep.subr.bf16.mxu0 %v2120_v42  ;;  %v1006_v4 = vld [vmem:[%s2361_s4 + $0x50] sm:$0xff]  ;;  %v1007_v5 = vld [vmem:[%s2361_s4 + $0x58] sm:$0xff] }
  0x2c   : > { %1655 = vmatprep.subr.bf16.mxu1 %v1654_v35 }
  0x2e   : > { %1717 = vmatpush3.bf16.msra.mxu0 %v2120_v42 }
  0x2f   : > { %1657 = vmatpush3.bf16.msra.mxu1 %v1654_v35  ;;  %1719 = vmatprep.subr.bf16.mxu0 %v2156_v56 }
  0x30   : > { %1659 = vmatprep.subr.bf16.mxu1 %v1658_v41 }
  0x32   : > { %1721 = vmatpush3.bf16.msra.mxu0 %v2156_v56 }
  0x33   : > { %1661 = vmatpush3.bf16.msra.mxu1 %v1658_v41  ;;  %1723 = vmatprep.subr.bf16.mxu0 %v2170_v61 }
  0x34   : > { %1663 = vmatprep.subr.bf16.mxu1 %v1662_v45 }
  0x36   : > { %1725 = vmatpush3.bf16.msra.mxu0 %v2170_v61 }
  0x37   : > { %1665 = vmatpush3.bf16.msra.mxu1 %v1662_v45  ;;  %1727 = vmatprep.subr.bf16.mxu0 %v2184_v3 }
  0x38   : > { %1667 = vmatprep.subr.bf16.mxu1 %v1666_v48 }
  0x3a   : > { %1729 = vmatpush3.bf16.msra.mxu0 %v2184_v3 }
  0x3b   : > { %1669 = vmatpush3.bf16.msra.mxu1 %v1666_v48  ;;  %1731 = vmatprep.subr.bf16.mxu0 %v2193_v6 }
  0x3c   : > { %1671 = vmatprep.subr.bf16.mxu1 %v2082_v27 }
  0x3e   : > { %1411 = vmatmul.mubr.f32.vlgmr.msra.gmra.mrb[0].mxu1 %v457_v49  ;;  %1733 = vmatpush3.bf16.msra.mxu0 %v2193_v6  ;;  %v999_v49 = vld [vmem:[%s2361_s4 + $0x18] sm:$0xff] }
  0x3f   : > { %1673 = vmatpush3.bf16.msra.mxu1 %v2082_v27  ;;  %1413 = vmatprep.mubr.f32.mxu1 %v458_v50 }
  0x40   : > { %1675 = vmatprep.subr.bf16.mxu1 %v2090_v31  ;;  %1735 = vmatprep.subr.bf16.mxu0 %v2082_v27 }
  0x42   : > { %1414 = vmatmul.mubr.f32.gmra.mrb[2].mxu1 %v459_v51  ;;  %v1000_v51 = vld [vmem:[%s2361_s4 + $0x20] sm:$0xff] }
  0x43   : > { %1677 = vmatpush3.bf16.msra.mxu1 %v2090_v31  ;;  %1416 = vmatprep.mubr.f32.mxu1 %v460_v52  ;;  %v1001_v52 = vld [vmem:[%s2361_s4 + $0x28] sm:$0xff] }
  0x44   : > { %1679 = vmatprep.subr.bf16.mxu1 %v2107_v37 }
  0x46   : > { %1417 = vmatmul.mubr.f32.gmra.mrb[4].mxu1 %v461_v53  ;;  %v1838_v53 = vpack.c.bf16 %v1001_v52, %v1000_v51 }
  0x47   : > { %1681 = vmatpush3.bf16.msra.mxu1 %v2107_v37  ;;  %1419 = vmatprep.mubr.f32.mxu1 %v462_v57 }
  0x48   : > { %1683 = vmatprep.subr.bf16.mxu1 %v2120_v42 }
  0x4a   : > { %1420 = vmatmul.mubr.f32.gmra.mrb[6].mxu1 %v463_v60 }
  0x4b   : > { %1685 = vmatpush3.bf16.msra.mxu1 %v2120_v42  ;;  %1422 = vmatprep.mubr.f32.mxu1 %v464_v62 }
  0x4c   : > { %1687 = vmatprep.subr.bf16.mxu1 %v2156_v56 }
  0x4e   : > { %1423 = vmatmul.mubr.f32.gmra.mrb[8].mxu1 %v465_v63 }
  0x4f   : > { %1689 = vmatpush3.bf16.msra.mxu1 %v2156_v56  ;;  %1425 = vmatprep.mubr.f32.mxu1 %v466_v2  ;;  %v1005_v2 = vld [vmem:[%s2361_s4 + $0x48] sm:$0xff] }
  0x50   : > { %1691 = vmatprep.subr.bf16.mxu1 %v2170_v61 }
  0x52   : > { %1426 = vmatmul.mubr.f32.gmra.mrb[10].mxu1 %v467_v7  ;;  %v1008_v7 = vld [vmem:[%s2361_s4 + $0x60] sm:$0xff] }
  0x53   : > { %1693 = vmatpush3.bf16.msra.mxu1 %v2170_v61 }
  0x54   : > { %1695 = vmatprep.subr.bf16.mxu1 %v2184_v3 }
  0x57   : > { %1697 = vmatpush3.bf16.msra.mxu1 %v2184_v3 }
  0x58   : > { %1699 = vmatprep.subr.bf16.mxu1 %v2193_v6 }
  0x5b   : > { %1701 = vmatpush3.bf16.msra.mxu1 %v2193_v6 }
 0x111   : > { %v1412_v9 = vpop.f32.mrb[0].mxu1 }
 0x112   : > { %v546_v10 = vadd.f32 %v1412_v9, %v2208_v8  ;;  %v540_v11 = vpop.f32.mrb[1].mxu1  ;;  %v1009_v9 = vld [vmem:[%s2361_s4 + $0x68] sm:$0xff] }
 0x113   : > { %v541_v12 = vadd.f32 %v2208_v8, %v540_v11  ;;  %v1854_v11 = vpack.c.bf16 %v1009_v9, %v1008_v7 }
 0x115   : > { %1908 = vtanh.f32 %v541_v12  ;;  %v1011_v12 = vld [vmem:[%s2361_s4 + $0x78] sm:$0xff] }
 0x116   : > { %1910 = vtanh.f32 %v546_v10  ;;  %v1010_v10 = vld [vmem:[%s2361_s4 + $0x70] sm:$0xff] }
 0x119   : > { %v1418_v13 = vpop.f32.mrb[4].mxu1 }
 0x11a   : > { %v560_v14 = vpop.f32.mrb[5].mxu1  ;;  %v566_v30 = vadd.f32 %v1418_v13, %v2208_v8  ;;  %v1858_v13 = vpack.c.bf16 %v1011_v12, %v1010_v10 }
 0x11b   : > { %v561_v32 = vadd.f32 %v2208_v8, %v560_v14 }
 0x11d   : > { %v1421_v17 = vpop.f32.mrb[6].mxu1 }
 0x11e   : > { %v570_v18 = vpop.f32.mrb[7].mxu1  ;;  %v576_v40 = vadd.f32 %v1421_v17, %v2208_v8 }
 0x11f   : > { %v1909_v15 = vpop.eup %1908  ;;  %v571_v41 = vadd.f32 %v2208_v8, %v570_v18 }
 0x120   : > { %v1911_v16 = vpop.eup %1910  ;;  %1460 = vmatprep.mubr.f32.mxu1 %v1909_v15 }
 0x121   : > { %1461 = vmatmul.mubr.f32.vlgmr.msra.gmra.mrb[2].mxu1 %v1911_v16  ;;  %v2212_v19 = vpop.f32.mrb[8].mxu1 }
 0x122   : > { %v2214_v20 = vpop.f32.mrb[9].mxu1  ;;  %v586_v57 = vadd.f32 %v2212_v19, %v2208_v8 }
 0x123   : > { %v581_v58 = vadd.f32 %v2208_v8, %v2214_v20 }
 0x125   : > { %v2216_v21 = vpop.f32.mrb[10].mxu1 }
 0x126   : > { %v2218_v22 = vpop.f32.mrb[11].mxu1  ;;  %v596_v14 = vadd.f32 %v2216_v21, %v2208_v8 }
 0x127   : > { %v591_v15 = vadd.f32 %v2208_v8, %v2218_v22 }
 0x1f4   : > { %v1462_v23 = vpop.f32.mrb[2].mxu1 }
 0x1f5   : > { %v1862_v24 = vadd.f32 %v1462_v23, %v2208_v8  ;;  %v667_v25 = vpop.f32.mrb[3].mxu1 }
 0x1f6   : > { %v1863_v26 = vadd.f32 %v2208_v8, %v667_v25  ;;  %v1238_v8 = vld [vmem:[%s2363_s6] ss:$0 sm:$0xff] }
 0x1f8   : > { %1912 = vtanh.f32 %v1863_v26 }
 0x1f9   : > { %1914 = vtanh.f32 %v1862_v24 }
 0x202   : > { %v1913_v28 = vpop.eup %1912 }
 0x203   : > { %v1915_v29 = vpop.eup %1914  ;;  %1495 = vmatprep.mubr.f32.mxu0 %v1913_v28 }
 0x204   : > { %1496 = vmatmul.mubr.f32.vlgmr.msra.gmra.mrb[0].mxu0 %v1915_v29 }
 0x205   : > { %1737 = vmatpush3.bf16.msra.mxu0 %v2082_v27 }
 0x206   : > { %1739 = vmatprep.subr.bf16.mxu0 %v2090_v31 }
 0x209   : > { %1741 = vmatpush3.bf16.msra.mxu0 %v2090_v31 }
 0x20a   : > { %1743 = vmatprep.subr.bf16.mxu0 %v2107_v37 }
 0x20d   : > { %1745 = vmatpush3.bf16.msra.mxu0 %v2107_v37 }
 0x20e   : > { %1747 = vmatprep.subr.bf16.mxu0 %v2120_v42 }
 0x211   : > { %1749 = vmatpush3.bf16.msra.mxu0 %v2120_v42 }
 0x212   : > { %1751 = vmatprep.subr.bf16.mxu0 %v2156_v56 }
 0x215   : > { %1753 = vmatpush3.bf16.msra.mxu0 %v2156_v56 }
 0x216   : > { %1755 = vmatprep.subr.bf16.mxu0 %v2170_v61 }
 0x219   : > { %1757 = vmatpush3.bf16.msra.mxu0 %v2170_v61 }
 0x21a   : > { %1759 = vmatprep.subr.bf16.mxu0 %v2184_v3 }
 0x21d   : > { %1761 = vmatpush3.bf16.msra.mxu0 %v2184_v3 }
 0x21e   : > { %1763 = vmatprep.subr.bf16.mxu0 %v2193_v6 }
 0x221   : > { %1765 = vmatpush3.bf16.msra.mxu0 %v2193_v6 }
 0x222   : > { %1767 = vmatprep.subr.bf16.mxu0 %v2082_v27 }
 0x2d7   : > { %v1497_v33 = vpop.f32.mrb[0].mxu0 }
 0x2d8   : > { %v756_v34 = vadd.f32 %v1497_v33, %v566_v30  ;;  %v746_v35 = vpop.f32.mrb[1].mxu0 }
 0x2d9   : > { %v755_v36 = vadd.f32 %v746_v35, %v561_v32 }
 0x2db   : > { %1916 = vtanh.f32 %v755_v36 }
 0x2dc   : > { %1918 = vtanh.f32 %v756_v34 }
 0x2e5   : > { %v1917_v38 = vpop.eup %1916 }
 0x2e6   : > { %v1919_v39 = vpop.eup %1918  ;;  %1530 = vmatprep.mubr.f32.mxu0 %v1917_v38 }
 0x2e7   : > { %1531 = vmatmul.mubr.f32.vlgmr.msra.gmra.mrb[2].mxu0 %v1919_v39 }
 0x2e8   : > { %1769 = vmatpush3.bf16.msra.mxu0 %v2082_v27 }
 0x2e9   : > { %1771 = vmatprep.subr.bf16.mxu0 %v2090_v31 }
 0x2ec   : > { %1773 = vmatpush3.bf16.msra.mxu0 %v2090_v31 }
 0x2ed   : > { %1775 = vmatprep.subr.bf16.mxu0 %v2107_v37 }
 0x2f0   : > { %1777 = vmatpush3.bf16.msra.mxu0 %v2107_v37 }
 0x2f1   : > { %1779 = vmatprep.subr.bf16.mxu0 %v2120_v42 }
 0x2f4   : > { %1781 = vmatpush3.bf16.msra.mxu0 %v2120_v42 }
 0x2f5   : > { %1783 = vmatprep.subr.bf16.mxu0 %v2156_v56 }
 0x2f8   : > { %1785 = vmatpush3.bf16.msra.mxu0 %v2156_v56 }
 0x2f9   : > { %1787 = vmatprep.subr.bf16.mxu0 %v2170_v61 }
 0x2fc   : > { %1789 = vmatpush3.bf16.msra.mxu0 %v2170_v61 }
 0x2fd   : > { %1791 = vmatprep.subr.bf16.mxu0 %v2184_v3 }
 0x300   : > { %1793 = vmatpush3.bf16.msra.mxu0 %v2184_v3 }
 0x301   : > { %1795 = vmatprep.subr.bf16.mxu0 %v2193_v6 }
 0x304   : > { %1797 = vmatpush3.bf16.msra.mxu0 %v2193_v6 }
 0x305   : > { %1799 = vmatprep.subr.bf16.mxu0 %v2082_v27 }
 0x3ba   : > { %v1532_v43 = vpop.f32.mrb[2].mxu0 }
 0x3bb   : > { %v835_v44 = vadd.f32 %v1532_v43, %v576_v40  ;;  %v825_v45 = vpop.f32.mrb[3].mxu0 }
 0x3bc   : > { %v834_v46 = vadd.f32 %v825_v45, %v571_v41 }
 0x3be   : > { %1920 = vtanh.f32 %v834_v46 }
 0x3bf   : > { %1922 = vtanh.f32 %v835_v44 }
 0x3c8   : > { %v1921_v47 = vpop.eup %1920 }
 0x3c9   : > { %v1923_v48 = vpop.eup %1922  ;;  %1565 = vmatprep.mubr.f32.mxu0 %v1921_v47 }
 0x3ca   : > { %1566 = vmatmul.mubr.f32.vlgmr.msra.gmra.mrb[4].mxu0 %v1923_v48 }
 0x3cb   : > { %1801 = vmatpush3.bf16.msra.mxu0 %v2082_v27  ;;  %v996_v27 = vld [vmem:[%s2361_s4] sm:$0xff] }
 0x3cc   : > { %1803 = vmatprep.subr.bf16.mxu0 %v2090_v31 }
 0x3cf   : > { %1805 = vmatpush3.bf16.msra.mxu0 %v2090_v31  ;;  %v997_v31 = vld [vmem:[%s2361_s4 + $0x8] sm:$0xff] }
 0x3d0   : > { %1807 = vmatprep.subr.bf16.mxu0 %v2107_v37 }
 0x3d3   : > { %1809 = vmatpush3.bf16.msra.mxu0 %v2107_v37  ;;  %v998_v37 = vld [vmem:[%s2361_s4 + $0x10] sm:$0xff] }
 0x3d4   : > { %1811 = vmatprep.subr.bf16.mxu0 %v2120_v42  ;;  %v1834_v50 = vpack.c.bf16 %v999_v49, %v998_v37 }
 0x3d7   : > { %1813 = vmatpush3.bf16.msra.mxu0 %v2120_v42  ;;  %v1830_v42 = vpack.c.bf16 %v997_v31, %v996_v27 }
 0x3d8   : > { %1815 = vmatprep.subr.bf16.mxu0 %v2156_v56 }
 0x3d9   : > { %1831 = vmatprep.subr.bf16.mxu1 %v1830_v42 }
 0x3da   : > { %1833 = vmatpush3.bf16.msra.mxu1 %v1830_v42 }
 0x3db   : > { %1817 = vmatpush3.bf16.msra.mxu0 %v2156_v56  ;;  %1835 = vmatprep.subr.bf16.mxu1 %v1834_v50  ;;  %v1842_v56 = vpack.c.bf16 %v1003_v55, %v1002_v54 }
 0x3dc   : > { %1819 = vmatprep.subr.bf16.mxu0 %v2170_v61 }
 0x3de   : > { %1837 = vmatpush3.bf16.msra.mxu1 %v1834_v50 }
 0x3df   : > { %1821 = vmatpush3.bf16.msra.mxu0 %v2170_v61  ;;  %1839 = vmatprep.subr.bf16.mxu1 %v1838_v53 }
 0x3e0   : > { %1823 = vmatprep.subr.bf16.mxu0 %v2184_v3 }
 0x3e2   : > { %1841 = vmatpush3.bf16.msra.mxu1 %v1838_v53 }
 0x3e3   : > { %1825 = vmatpush3.bf16.msra.mxu0 %v2184_v3  ;;  %1843 = vmatprep.subr.bf16.mxu1 %v1842_v56  ;;  %v1846_v3 = vpack.c.bf16 %v1005_v2, %v1004_v1 }
 0x3e4   : > { %1827 = vmatprep.subr.bf16.mxu0 %v2193_v6 }
 0x3e6   : > { %1845 = vmatpush3.bf16.msra.mxu1 %v1842_v56 }
 0x3e7   : > { %1829 = vmatpush3.bf16.msra.mxu0 %v2193_v6  ;;  %1847 = vmatprep.subr.bf16.mxu1 %v1846_v3  ;;  %v1850_v6 = vpack.c.bf16 %v1007_v5, %v1006_v4 }
 0x3ea   : > { %1849 = vmatpush3.bf16.msra.mxu1 %v1846_v3 }
 0x3eb   : > { %1851 = vmatprep.subr.bf16.mxu1 %v1850_v6 }
 0x3ee   : > { %1853 = vmatpush3.bf16.msra.mxu1 %v1850_v6 }
 0x3ef   : > { %1855 = vmatprep.subr.bf16.mxu1 %v1854_v11 }
 0x3f2   : > { %1857 = vmatpush3.bf16.msra.mxu1 %v1854_v11 }
 0x3f3   : > { %1859 = vmatprep.subr.bf16.mxu1 %v1858_v13 }
 0x3f6   : > { %1861 = vmatpush3.bf16.msra.mxu1 %v1858_v13 }
 0x49d   : > { %v1567_v59 = vpop.f32.mrb[4].mxu0 }
 0x49e   : > { %v914_v60 = vadd.f32 %v1567_v59, %v586_v57  ;;  %v904_v61 = vpop.f32.mrb[5].mxu0 }
 0x49f   : > { %v913_v62 = vadd.f32 %v904_v61, %v581_v58 }
 0x4a1   : > { %1924 = vtanh.f32 %v913_v62 }
 0x4a2   : > { %1926 = vtanh.f32 %v914_v60 }
 0x4ab   : > { %v1925_v63 = vpop.eup %1924 }
 0x4ac   : > { %v1927_v0 = vpop.eup %1926  ;;  %1600 = vmatprep.mubr.f32.mxu0 %v1925_v63 }
 0x4ad   : > { %1601 = vmatmul.mubr.f32.vlgmr.msra.gmra.mrb[6].mxu0 %v1927_v0 }
 0x580   : > { %v1602_v16 = vpop.f32.mrb[6].mxu0 }
 0x581   : > { %v993_v17 = vadd.f32 %v1602_v16, %v596_v14  ;;  %v983_v18 = vpop.f32.mrb[7].mxu0 }
 0x582   : > { %v992_v19 = vadd.f32 %v983_v18, %v591_v15 }
 0x584   : > { %1928 = vtanh.f32 %v992_v19 }
 0x585   : > { %1930 = vtanh.f32 %v993_v17 }
 0x58e   : > { %v1929_v20 = vpop.eup %1928 }
 0x58f   : > { %v1931_v21 = vpop.eup %1930  ;;  %1635 = vmatprep.mubr.f32.mxu1 %v1929_v20  ;;  %1116 = vst [vmem:[%s421_s16] sm:$0xff] %v1929_v20 }
 0x590   : > { %1636 = vmatmul.mubr.f32.vlgmr.msra.gmra.mrb[12].mxu1 %v1931_v21  ;;  %1117 = vst [vmem:[%s421_s16 + $0x8] sm:$0xff] %v1931_v21 }
 0x663   : > { %v1637_v22 = vpop.f32.mrb[12].mxu1 }
 0x664   : > { %v1085_v23 = vpop.f32.mrb[13].mxu1  ;;  %v1091_v25 = vadd.f32 %v1637_v22, %v1238_v8 }
 0x665   : > { %v1086_v24 = vadd.f32 %v1238_v8, %v1085_v23 }
 0x667   : > { %1094 = vmax.xlane.f32.xlu0 %v1086_v24 }
 0x66b   : > { %1096 = vmax.xlane.f32.xlu0 %v1091_v25 }
 0x6f4   : > { %v1095_v26 = vpop.xlane.xlu0 %1094 }
 0x6f5   : > { %v1098_v28 = vsub.f32 %v1086_v24, %v1095_v26 }
 0x6f7   : > { %v1100_v29 = vmul.f32 1.442695, %v1098_v28 }
 0x6f8   : > { %v1097_v30 = vpop.xlane.xlu0 %1096 }
 0x6f9   : > { %v1099_v32 = vsub.f32 %v1091_v25, %v1097_v30  ;;  %1932 = vpow2.f32 %v1100_v29 }
 0x6fb   : > { %v1102_v33 = vmul.f32 1.442695, %v1099_v32 }
 0x6fd   : > { %1934 = vpow2.f32 %v1102_v33 }
 0x703   : > { %v1933_v34 = vpop.eup %1932 }
 0x704   : > { %1104 = vadd.xlane.f32.xlu1 %v1933_v34 }
 0x707   : > { %v1935_v35 = vpop.eup %1934 }
 0x708   : > { %1106 = vadd.xlane.f32.xlu1 %v1935_v35 }
 0x791   : > { %v1105_v36 = vpop.xlane.xlu1 %1104 }
 0x792   : > { %1936 = vlog2.f32 %v1105_v36 }
 0x795   : > { %v1107_v38 = vpop.xlane.xlu1 %1106 }
 0x796   : > { %1938 = vlog2.f32 %v1107_v38 }
 0x79c   : > { %v1937_v39 = vpop.eup %1936 }
 0x79d   : > { %v1109_v40 = vmul.f32 0.6931472, %v1937_v39 }
 0x79f   : > { %v1112_v41 = vsub.f32 %v1098_v28, %v1109_v40 }
 0x7a0   : > { %v1939_v43 = vpop.eup %1938 }
 0x7a1   : > { %1114 = vst [vmem:[%s415_s21] sm:$0xff] %v1112_v41  ;;  %v1111_v44 = vmul.f32 0.6931472, %v1939_v43 }
 0x7a3   : > { %v1113_v45 = vsub.f32 %v1099_v32, %v1111_v44 }
 0x7a5   : > { %1115 = vst [vmem:[%s415_s21 + $0x8] sm:$0xff] %v1113_v45 }
 0x7a6 PF: > { %p16_p9 = scmp.ge.s32.totalorder %s2026_s30, 4   ;;  %s2366_s26 = smov %s1958_s27 }
 0x7a7   : > { %s2367_s27 = smov %s2035_s11  ;;  %s2368_s28 = smov %s2026_s30 }
 0x7a8   :  { %18 = sbr.rel (!%p16_p9) target bundleno = 2 (0x2), region = 136 }

</bundles_post_ra>
